<compile_context>
chip_gen: v5e
topology: v5e:2x2
jax: 0.10.0
libtpu: 0.0.40
codegen_flags: <defaults>
</compile_context>

<pallas_src>
import jax
import jax.numpy as jnp
from jax import lax
from jax.experimental import pallas as pl
from jax.experimental.pallas import tpu as pltpu


def _round_up(v, m):
    return ((v + m - 1) // m) * m


def basic_nn_kernel(x_ref, w1_ref, b1_ref, w2_ref, b2_ref, w3t_ref, b3_ref,
                    out_ref):
    x = x_ref[...]                                                   # [TB, D]

    # fc1 (+ folded BN1) + ReLU ; dropout1 is identity in eval mode
    h1 = jnp.dot(x, w1_ref[...],
                 preferred_element_type=jnp.float32) + b1_ref[...]
    h1 = jnp.maximum(h1, 0.0)                                        # f32

    # fc2 (+ folded BN2) + ReLU ; dropout2 is identity in eval mode
    # (cast to the weight dtype only at the dot input; no-op in the f32 path)
    h2 = jnp.dot(h1.astype(w2_ref.dtype), w2_ref[...],
                 preferred_element_type=jnp.float32) + b2_ref[...]
    h2 = jnp.maximum(h2, 0.0)                                        # f32

    # fc3 -> raw logits, computed transposed so the batch dim lands on the
    # lane axis: (1, N2) x (TB, N2)^T -> (1, TB).  Lane-dense out block.
    logits_t = lax.dot_general(
        w3t_ref[...], h2.astype(w3t_ref.dtype),
        dimension_numbers=(((1,), (1,)), ((), ())),
        preferred_element_type=jnp.float32) + b3_ref[...]            # [1, TB]

    out_ref[...] = logits_t[None].astype(out_ref.dtype)              # [1,1,TB]


def basic_nn_forward(x, folded, *, block_b=4096, compute_dtype=jnp.float32):
    """x: [B, D] float32.  `folded` holds the BN-folded fc weights/biases."""
    B, D = x.shape
    N1 = folded["w1"].shape[1]
    N2 = folded["w2"].shape[1]

    # ---- batch-tile selection -------------------------------------------
    # TB is a multiple of 8 (sublane).  Force >= 2 grid steps whenever the
    # batch is big enough so v7x's two TensorCores both get work.
    B8 = _round_up(B, 8)
    n_tiles = max(pl.cdiv(B8, block_b), 2 if B8 >= 16 else 1)
    TB = _round_up(pl.cdiv(B8, n_tiles), 8)
    Bp = n_tiles * TB
    if Bp != B:
        x = jnp.pad(x, ((0, Bp - B), (0, 0)))
    # TODO(synk): for batches that are not a multiple of TB, the host-side pad
    # could be dropped in favor of Pallas ragged-last-block clipping.

    cd = compute_dtype
    xq = x.astype(cd)
    w1 = folded["w1"].astype(cd)
    w2 = folded["w2"].astype(cd)
    w3t = folded["w3"].T.astype(cd)            # (1, N2), pre-transposed fc3
    b1, b2, b3 = folded["b1"], folded["b2"], folded["b3"]   # biases stay f32

    # Weights/biases: constant index_map -> VMEM-resident across grid steps.
    resident = lambda shape: pl.BlockSpec(shape, lambda i: (0, 0))

    out = pl.pallas_call(
        basic_nn_kernel,
        out_shape=jax.ShapeDtypeStruct((n_tiles, 1, TB), jnp.float32),
        grid=(n_tiles,),
        in_specs=[
            pl.BlockSpec((TB, D), lambda i: (i, 0)),   # x: streamed per tile
            resident((D, N1)),  resident((1, N1)),     # fc1 (BN1 folded in)
            resident((N1, N2)), resident((1, N2)),     # fc2 (BN2 folded in)
            resident((1, N2)),  resident((1, 1)),      # fc3 (transposed)
        ],
        # Lane-dense output block: batch on the lane axis -> unmasked stores.
        out_specs=pl.BlockSpec((1, 1, TB), lambda i: (i, 0, 0)),
        compiler_params=pltpu.CompilerParams(
            dimension_semantics=("parallel",),
            vmem_limit_bytes=32 * 1024 * 1024),
    )(xq, w1, b1, w2, b2, w3t, b3)

    return out.reshape(Bp, 1)[:B]


def make_params(key, input_dim, n1=128, n2=64):
    """Raw (unfolded) params mirroring PyTorch BasicNN in eval mode."""
    ks = jax.random.split(key, 12)

    def lin(k, fan_in, fan_out):
        bound = 1.0 / (fan_in ** 0.5)
        kw, kb = jax.random.split(k)
        w = jax.random.uniform(kw, (fan_in, fan_out), jnp.float32, -bound, bound)
        b = jax.random.uniform(kb, (1, fan_out), jnp.float32, -bound, bound)
        return w, b

    w1, b1 = lin(ks[0], input_dim, n1)
    w2, b2 = lin(ks[1], n1, n2)
    w3, b3 = lin(ks[2], n2, 1)

    # BatchNorm1d eval-mode params (random affine + nontrivial running stats).
    bn1_w = jax.random.uniform(ks[3], (1, n1), jnp.float32, 0.5, 1.5)
    bn1_b = jax.random.uniform(ks[4], (1, n1), jnp.float32, -0.5, 0.5)
    rm1 = jax.random.uniform(ks[5], (1, n1), jnp.float32, -0.3, 0.3)
    rv1 = jax.random.uniform(ks[6], (1, n1), jnp.float32, 0.5, 1.5)
    bn2_w = jax.random.uniform(ks[7], (1, n2), jnp.float32, 0.5, 1.5)
    bn2_b = jax.random.uniform(ks[8], (1, n2), jnp.float32, -0.5, 0.5)
    rm2 = jax.random.uniform(ks[9], (1, n2), jnp.float32, -0.3, 0.3)
    rv2 = jax.random.uniform(ks[10], (1, n2), jnp.float32, 0.5, 1.5)

    return dict(w1=w1, b1=b1, w2=w2, b2=b2, w3=w3, b3=b3,
                bn1_w=bn1_w, bn1_b=bn1_b, rm1=rm1, rv1=rv1,
                bn2_w=bn2_w, bn2_b=bn2_b, rm2=rm2, rv2=rv2)


def fold_params(p, eps=1e-5):
    """Fold eval-mode BatchNorm into the preceding Linear (host side)."""
    s1 = p["bn1_w"] / jnp.sqrt(p["rv1"] + eps)          # (1, n1)
    t1 = p["bn1_b"] - p["rm1"] * s1
    s2 = p["bn2_w"] / jnp.sqrt(p["rv2"] + eps)          # (1, n2)
    t2 = p["bn2_b"] - p["rm2"] * s2
    return dict(
        w1=p["w1"] * s1, b1=p["b1"] * s1 + t1,
        w2=p["w2"] * s2, b2=p["b2"] * s2 + t2,
        w3=p["w3"], b3=p["b3"],
    )


def reference_forward(x, p, eps=1e-5):
    """Pure-JAX mirror of PyTorch BasicNN.forward in eval mode (unfolded BN)."""
    h1 = x @ p["w1"] + p["b1"]
    h1 = (h1 - p["rm1"]) / jnp.sqrt(p["rv1"] + eps) * p["bn1_w"] + p["bn1_b"]
    h1 = jnp.maximum(h1, 0.0)                            # dropout1: identity (eval)
    h2 = h1 @ p["w2"] + p["b2"]
    h2 = (h2 - p["rm2"]) / jnp.sqrt(p["rv2"] + eps) * p["bn2_w"] + p["bn2_b"]
    h2 = jnp.maximum(h2, 0.0)                            # dropout2: identity (eval)
    return h2 @ p["w3"] + p["b3"]


if __name__ == "__main__":
    B, D = 8, 32                       # batch, input_dim (telco feature count)
    key = jax.random.PRNGKey(0)
    kx, kp = jax.random.split(key)
    x = jax.random.normal(kx, (B, D), jnp.float32)
    params = make_params(kp, D)
    folded = fold_params(params)
    ref = reference_forward(x, params)

    # f32 path: tight check against the unfolded eval-mode reference.
    out = basic_nn_forward(x, folded)
    out = jax.block_until_ready(out)
    assert out.shape == (B, 1)
    assert jnp.max(jnp.abs(out - ref)) < 1e-4, "f32 mismatch vs JAX reference"

    # bf16-input path (f32 accumulate): the HBM/MXU roofline lever on v6e/v7x.
    out_bf16 = basic_nn_forward(x, folded, compute_dtype=jnp.bfloat16)
    out_bf16 = jax.block_until_ready(out_bf16)
    assert out_bf16.shape == (B, 1)
    assert jnp.max(jnp.abs(out_bf16 - ref)) < 1e-1, "bf16 mismatch vs reference"

    print("KERNEL_OK")
</pallas_src>

<mosaic_0001>
module attributes {stable_mosaic.version = 11 : i64} {
  func.func @basic_nn_kernel(%arg0: i32, %arg1: memref<8x32xf32, #tpu.memory_space<vmem>>, %arg2: memref<32x128xf32, #tpu.memory_space<vmem>>, %arg3: memref<1x128xf32, #tpu.memory_space<vmem>>, %arg4: memref<128x64xf32, #tpu.memory_space<vmem>>, %arg5: memref<1x64xf32, #tpu.memory_space<vmem>>, %arg6: memref<1x64xf32, #tpu.memory_space<vmem>>, %arg7: memref<1x1xf32, #tpu.memory_space<vmem>>, %arg8: memref<1x1x8xf32, #tpu.memory_space<vmem>>) attributes {dimension_semantics = [#tpu.dimension_semantics<parallel>], iteration_bounds = array<i64: 1>, scalar_prefetch = 0 : i64, scratch_operands = 0 : i64, tpu.core_type = #tpu.core_type<tc>, window_params = [{transform_indices = @transform_0, window_bounds = array<i64: 8, 32>}, {pipeline_mode = #tpu.pipeline_mode<synchronous>, transform_indices = @transform_1, window_bounds = array<i64: 32, 128>}, {pipeline_mode = #tpu.pipeline_mode<synchronous>, transform_indices = @transform_2, window_bounds = array<i64: 1, 128>}, {pipeline_mode = #tpu.pipeline_mode<synchronous>, transform_indices = @transform_3, window_bounds = array<i64: 128, 64>}, {pipeline_mode = #tpu.pipeline_mode<synchronous>, transform_indices = @transform_4, window_bounds = array<i64: 1, 64>}, {pipeline_mode = #tpu.pipeline_mode<synchronous>, transform_indices = @transform_5, window_bounds = array<i64: 1, 64>}, {pipeline_mode = #tpu.pipeline_mode<synchronous>, transform_indices = @transform_6, window_bounds = array<i64: 1, 1>}, {transform_indices = @transform_7, window_bounds = array<i64: 1, 1, 8>}]} {
    %c0 = arith.constant 0 : index
    %c0_0 = arith.constant 0 : index
    %0 = vector.load %arg1[%c0, %c0_0] : memref<8x32xf32, #tpu.memory_space<vmem>>, vector<8x32xf32>
    %c0_1 = arith.constant 0 : index
    %c0_2 = arith.constant 0 : index
    %1 = vector.load %arg2[%c0_1, %c0_2] : memref<32x128xf32, #tpu.memory_space<vmem>>, vector<32x128xf32>
    %cst = arith.constant dense<0.000000e+00> : vector<8x128xf32>
    %2 = tpu.matmul %0, %1, %cst {dimension_numbers = #tpu.dot_dimension_numbers<[1], [0], [0], [1], [0, 0, 1, 1], [], []>} : vector<8x32xf32>, vector<32x128xf32>, vector<8x128xf32> -> vector<8x128xf32>
    %c0_3 = arith.constant 0 : index
    %c0_4 = arith.constant 0 : index
    %3 = vector.load %arg3[%c0_3, %c0_4] : memref<1x128xf32, #tpu.memory_space<vmem>>, vector<1x128xf32>
    %4 = vector.broadcast %3 : vector<1x128xf32> to vector<8x128xf32>
    %5 = arith.addf %2, %4 : vector<8x128xf32>
    %cst_5 = arith.constant 0.000000e+00 : f32
    %6 = vector.broadcast %cst_5 : f32 to vector<8x128xf32>
    %7 = arith.maximumf %5, %6 : vector<8x128xf32>
    %c0_6 = arith.constant 0 : index
    %c0_7 = arith.constant 0 : index
    %8 = vector.load %arg4[%c0_6, %c0_7] : memref<128x64xf32, #tpu.memory_space<vmem>>, vector<128x64xf32>
    %cst_8 = arith.constant dense<0.000000e+00> : vector<8x64xf32>
    %9 = tpu.matmul %7, %8, %cst_8 {dimension_numbers = #tpu.dot_dimension_numbers<[1], [0], [0], [1], [0, 0, 1, 1], [], []>} : vector<8x128xf32>, vector<128x64xf32>, vector<8x64xf32> -> vector<8x64xf32>
    %c0_9 = arith.constant 0 : index
    %c0_10 = arith.constant 0 : index
    %10 = vector.load %arg5[%c0_9, %c0_10] : memref<1x64xf32, #tpu.memory_space<vmem>>, vector<1x64xf32>
    %11 = vector.broadcast %10 : vector<1x64xf32> to vector<8x64xf32>
    %12 = arith.addf %9, %11 : vector<8x64xf32>
    %cst_11 = arith.constant 0.000000e+00 : f32
    %13 = vector.broadcast %cst_11 : f32 to vector<8x64xf32>
    %14 = arith.maximumf %12, %13 : vector<8x64xf32>
    %c0_12 = arith.constant 0 : index
    %c0_13 = arith.constant 0 : index
    %15 = vector.load %arg6[%c0_12, %c0_13] : memref<1x64xf32, #tpu.memory_space<vmem>>, vector<1x64xf32>
    %cst_14 = arith.constant dense<0.000000e+00> : vector<1x8xf32>
    %16 = tpu.matmul %15, %14, %cst_14 {dimension_numbers = #tpu.dot_dimension_numbers<[1], [1], [0], [0], [0, 0, 1, 0], [], []>} : vector<1x64xf32>, vector<8x64xf32>, vector<1x8xf32> -> vector<1x8xf32>
    %c0_15 = arith.constant 0 : index
    %c0_16 = arith.constant 0 : index
    %17 = vector.load %arg7[%c0_15, %c0_16] : memref<1x1xf32, #tpu.memory_space<vmem>>, vector<1x1xf32>
    %18 = vector.broadcast %17 : vector<1x1xf32> to vector<1x8xf32>
    %19 = arith.addf %16, %18 : vector<1x8xf32>
    %20 = vector.shape_cast %19 : vector<1x8xf32> to vector<1x1x8xf32>
    %c0_17 = arith.constant 0 : index
    %c0_18 = arith.constant 0 : index
    %c0_19 = arith.constant 0 : index
    %21 = vector.load %arg8[%c0_17, %c0_18, %c0_19] : memref<1x1x8xf32, #tpu.memory_space<vmem>>, vector<1x1x8xf32>
    tpu.vector_store %arg8[%c0_17, %c0_18, %c0_19], %20 {strides = array<i32>} : memref<1x1x8xf32, #tpu.memory_space<vmem>>, vector<1x1x8xf32>,
    return
  }
  func.func @transform_0(%arg0: i32) -> (i32, i32) {
    %c0_i32 = arith.constant 0 : i32
    %c0_i32_0 = arith.constant 0 : i32
    return %arg0, %c0_i32 : i32, i32
  }
  func.func @transform_1(%arg0: i32) -> (i32, i32) {
    %c0_i32 = arith.constant 0 : i32
    %c0_i32_0 = arith.constant 0 : i32
    %c0_i32_1 = arith.constant 0 : i32
    return %c0_i32, %c0_i32_0 : i32, i32
  }
  func.func @transform_2(%arg0: i32) -> (i32, i32) {
    %c0_i32 = arith.constant 0 : i32
    %c0_i32_0 = arith.constant 0 : i32
    %c0_i32_1 = arith.constant 0 : i32
    return %c0_i32, %c0_i32_0 : i32, i32
  }
  func.func @transform_3(%arg0: i32) -> (i32, i32) {
    %c0_i32 = arith.constant 0 : i32
    %c0_i32_0 = arith.constant 0 : i32
    %c0_i32_1 = arith.constant 0 : i32
    return %c0_i32, %c0_i32_0 : i32, i32
  }
  func.func @transform_4(%arg0: i32) -> (i32, i32) {
    %c0_i32 = arith.constant 0 : i32
    %c0_i32_0 = arith.constant 0 : i32
    %c0_i32_1 = arith.constant 0 : i32
    return %c0_i32, %c0_i32_0 : i32, i32
  }
  func.func @transform_5(%arg0: i32) -> (i32, i32) {
    %c0_i32 = arith.constant 0 : i32
    %c0_i32_0 = arith.constant 0 : i32
    %c0_i32_1 = arith.constant 0 : i32
    return %c0_i32, %c0_i32_0 : i32, i32
  }
  func.func @transform_6(%arg0: i32) -> (i32, i32) {
    %c0_i32 = arith.constant 0 : i32
    %c0_i32_0 = arith.constant 0 : i32
    %c0_i32_1 = arith.constant 0 : i32
    return %c0_i32, %c0_i32_0 : i32, i32
  }
  func.func @transform_7(%arg0: i32) -> (i32, i32, i32) {
    %c0_i32 = arith.constant 0 : i32
    %c0_i32_0 = arith.constant 0 : i32
    %c0_i32_1 = arith.constant 0 : i32
    return %arg0, %c0_i32, %c0_i32_0 : i32, i32, i32
  }
}

</mosaic_0001>

<bundles_post_ra>
// kernel: tpu_custom_call.1
= control target key start
LH: loop header
LB: loop body
LE: loop exit
PB: predicated region body
PF: predicated region fallthrough
CT: control target
= control target key end

     0   :  { %s311_s0 = inlined_call_operand.vmem [shape: f32[8,32], index: 0, kind: input, shape index: {}]   ;;  %s312_s1 = inlined_call_operand.vmem [shape: f32[32,128], index: 1, kind: input, shape index: {}]   ;;  %s313_s2 = inlined_call_operand.vmem [shape: f32[1,128], index: 2, kind: input, shape index: {}]   ;;  %s314_s3 = inlined_call_operand.vmem [shape: f32[128,64], index: 3, kind: input, shape index: {}]   ;;  %s315_s4 = inlined_call_operand.vmem [shape: f32[1,64], index: 4, kind: input, shape index: {}]   ;;  %s316_s5 = inlined_call_operand.vmem [shape: f32[1,64], index: 5, kind: input, shape index: {}]   ;;  %s317_s6 = inlined_call_operand.<no memory space> [shape: f32[1,1], index: 6, kind: input, shape index: {}]   ;;  %s318_s7 = inlined_call_operand.hbm [shape: f32[1,1,8], index: 7, kind: output, shape index: {}]  }
   0x1   :  { %v12_v0 = vstv %s317_s6 }
   0x2   :  { %13 = vst [vmem:[#allocation2] sm:$0x1] %v12_v0 }
   0x3   :  { %v33_v1 = vld [vmem:[%s312_s1 + $0x18] sm:$0xff]  ;;  %v32_v2 = vld [vmem:[%s312_s1 + $0x10] sm:$0xff]  ;;  %v31_v4 = vld [vmem:[%s312_s1 + $0x8] sm:$0xff]  ;;  %vm38_vm0 = vcmask 261120  }
   0x4   :  { %54 = vmatpush.msra.mxu0 %v33_v1  ;;  %v78_v3 = vld [vmem:[%s314_s3 + $0x78] sm:$0xff]  ;;  %v77_v5 = vld [vmem:[%s314_s3 + $0x70] sm:$0xff]  ;;  %v76_v6 = vld [vmem:[%s314_s3 + $0x68] sm:$0xff] }
   0x5   :  { %83 = vmatpush.msra.mxu1 %v78_v3  ;;  %v30_v7 = vld [vmem:[%s312_s1] sm:$0xff]  ;;  %v74_v10 = vld [vmem:[%s314_s3 + $0x58] sm:$0xff] }
   0x6   :  { %55 = vmatpush.msra.mxu0 %v32_v2  ;;  %v29_v8 = vld [vmem:[%s311_s0] sm:$0xff] }
   0x7   :  { %84 = vmatpush.msra.mxu1 %v77_v5  ;;  %v75_v9 = vld [vmem:[%s314_s3 + $0x60] sm:$0xff] }
   0x8   :  { %56 = vmatpush.msra.mxu0 %v31_v4 }
   0x9   :  { %85 = vmatpush.msra.mxu1 %v76_v6 }
   0xa   :  { %57 = vmatpush.msra.mxu0 %v30_v7 }
   0xb   :  { %14 = vsyncpa [#allocation4], 0  ;;  %157 = vmatmul.msk.f32.vlgmr.msra.gmra.mxu0 %vm38_vm0, %v29_v8  ;;  %86 = vmatpush.msra.mxu1 %v75_v9  ;;  %v73_v11 = vld [vmem:[%s314_s3 + $0x50] sm:$0xff]  ;;  %v72_v12 = vld [vmem:[%s314_s3 + $0x48] sm:$0xff]  ;;  %v191_v27 = vmov 0   ;;  %vm112_vm1 = vcmask 523264  }
   0xc   :  { %v71_v13 = vld [vmem:[%s314_s3 + $0x40] sm:$0xff]  ;;  %v70_v14 = vld [vmem:[%s314_s3 + $0x38] sm:$0xff]  ;;  %v69_v15 = vld [vmem:[%s314_s3 + $0x30] sm:$0xff]  ;;  %162 = vset.pattern.permute.xlu0 %v191_v27  ;;  %s148_s24 = sshll.u32 %s318_s7, 4  ;;  %vm139_vm2 = vcmask 57344   ;;  %s149_s24 = int_to_ptr.hbm [resolvable:$true] %s148_s24 }
   0xd   :  { %87 = vmatpush.msra.mxu1 %v74_v10  ;;  %v68_v16 = vld [vmem:[%s314_s3 + $0x28] sm:$0xff]  ;;  %v67_v17 = vld [vmem:[%s314_s3 + $0x20] sm:$0xff]  ;;  %v66_v18 = vld [vmem:[%s314_s3 + $0x18] sm:$0xff] }
   0xe   :  { %v65_v19 = vld [vmem:[%s314_s3 + $0x10] sm:$0xff]  ;;  %v64_v20 = vld [vmem:[%s314_s3 + $0x8] sm:$0xff]  ;;  %v63_v21 = vld [vmem:[%s314_s3] sm:$0xff] }
   0xf   :  { %88 = vmatpush.msra.mxu1 %v73_v11  ;;  %v163_v22 = vld [vmem:[%s313_s2] ss:$0 sm:$0xff]  ;;  %s192_s2 = smov [#allocation3]  }
  0x10   :  { %v105_v26 = vld [vmem:[#allocation2] sm:$0x1]  ;;  %s146_s22 = sshll.u32 %s192_s2, 4  ;;  %s147_s22 = int_to_ptr.vmem [resolvable:$true] %s146_s22 }
  0x11   :  { %89 = vmatpush.msra.mxu1 %v72_v12  ;;  %108 = vperm.xlu0 %162, %v105_v26   ;;  %v164_v28 = vld [vmem:[%s315_s4] ss:$0 sm:$0xff] }
  0x12   :  { %v104_v32 = vld [vmem:[%s316_s5] sm:$0x1] }
  0x13   :  { %90 = vmatpush.msra.mxu1 %v71_v13 }
  0x15   :  { %91 = vmatpush.msra.mxu1 %v70_v14 }
  0x17   :  { %92 = vmatpush.msra.mxu1 %v69_v15 }
  0x19   :  { %93 = vmatpush.msra.mxu1 %v68_v16 }
  0x1b   :  { %94 = vmatpush.msra.mxu1 %v67_v17 }
  0x1d   :  { %95 = vmatpush.msra.mxu1 %v66_v18 }
  0x1f   :  { %96 = vmatpush.msra.mxu1 %v65_v19 }
  0x21   :  { %97 = vmatpush.msra.mxu1 %v64_v20 }
  0x23   :  { %98 = vmatpush.msra.mxu1 %v63_v21 }
  0x83   :  { %v109_v33 = vpop.permute.xlu0 %108 }
  0x84   :  { %v111_v34 = vperm.slane %v109_v33, 0 }
  0x88   :  { %v59_v23 = vpop.f32.mrf.mxu0 }
  0x89   :  { %v60_v24 = vadd.f32 %v163_v22, %v59_v23 }
  0x8b   :  { %v62_v25 = vmax.f32 %v60_v24, 0.0 }
  0x8d   :  { %99 = vmatmul.f32.vlgmr.msra.gmra.mxu1 %v62_v25 }
 0x10a   :  { %v100_v29 = vpop.f32.mrf.mxu1 }
 0x10b   :  { %v101_v30 = vadd.f32 %v164_v28, %v100_v29 }
 0x10d   :  { %v103_v31 = vmax.f32 %v101_v30, 0.0 }
 0x10f   :  { %158 = vmatpush.xpose.msk.msra.mxu2 %vm112_vm1, %v103_v31 }
 0x112   :  { %159 = vmatmul.msk.f32.vlgmr.msra.gmra.mxu2 %vm112_vm1, %v104_v32 }
 0x195   :  { %v136_v35 = vpop.f32.mrf.mxu2 }
 0x196   :  { %v137_v36 = vadd.f32 %v136_v35, %v111_v34 }
 0x198   :  { %140 = vst.msk [vmem:[#allocation3] sm:$0x1] %vm139_vm2, %v137_v36 }
 0x199   :  { %151 = dma.vmem_to_hbm [thread:$0]  %s147_s22, 16, %s149_s24, [#allocation4]  }
 0x19a   :  { %189 = dma.done.wait [#allocation4], 16  }
 0x19b   :  { %190 = vsyncadd [#allocation4], 4294967280 }
 0x19c   :  { %156 = vsyncpa [#allocation4], 1 }

</bundles_post_ra>
